<compile_context>
chip_gen: v6e
topology: v6e:2x2x1
jax: 0.10.0
libtpu: 0.0.40
codegen_flags: <defaults>
</compile_context>

<pallas_src>
import jax
import jax.numpy as jnp
from jax.experimental import pallas as pl
from jax.experimental.pallas import tpu as pltpu


# ---------------------------------------------------------------------------
# Kernel: grid = (rows/tm, V/tn, D/tk)
#   acc  += x_tile @ Wt_tile          (tm, tn)   base path, f32 acc
#   mid  += x_tile @ At_tile          (tm, r)    LoRA rank-r projection
#   at k == last:  out = acc + mid @ Bt_tile     (bias folded into acc init)
# ---------------------------------------------------------------------------
def _lora_head_kernel(x_ref, wt_ref, at_ref, bt_ref, bias_ref, out_ref,
                      acc_ref, mid_ref):
    k = pl.program_id(2)

    @pl.when(k == 0)
    def _init():
        # Initialise the accumulator with the bias tile (saves an epilogue add).
        acc_ref[...] = jnp.broadcast_to(bias_ref[...], acc_ref.shape)
        mid_ref[...] = jnp.zeros_like(mid_ref)

    x = x_ref[...]                                               # (tm, tk) bf16
    acc_ref[...] += jnp.dot(x, wt_ref[...],
                            preferred_element_type=jnp.float32)  # base path
    mid_ref[...] += jnp.dot(x, at_ref[...],
                            preferred_element_type=jnp.float32)  # LoRA rank-r

    @pl.when(k == pl.num_programs(2) - 1)
    def _flush():
        lora = jnp.dot(mid_ref[...], bt_ref[...],
                       preferred_element_type=jnp.float32)       # (tm, tn)
        out_ref[...] = acc_ref[...] + lora


def _round_up(x, m):
    return (x + m - 1) // m * m


def transformer_forward(input_ids, params, *, tm=256, tn=512, tk=512):
    """Forward pass of the abstract Transformer (no blocks) with LoRA head."""
    te_table = params["te"]          # (vocab, d_model)
    pem = params["pem"]              # (maxlen, d_model)
    w = params["w"]                  # (vocab, d_model)
    bias = params["bias"]            # (vocab,)
    lora_a = params["lora_a"]        # (r, d_model)
    lora_b = params["lora_b"]        # (vocab, r)
    scaling = params["scaling"]      # lora_alpha / r

    B, L = input_ids.shape
    V, D = w.shape
    r = lora_a.shape[0]
    rows = B * L

    # --- JAX glue: embedding gather + positional add + flatten to 2-D -------
    # TODO(synk): the gather could be fused into the kernel with
    # PrefetchScalarGridSpec + a pl.Element row-gather index_map at large B*L*D.
    x = jnp.take(te_table, input_ids, axis=0) + pem[:L][None]     # (B, L, D) f32
    x2d = x.reshape(rows, D).astype(jnp.bfloat16)                 # (rows, D)

    # --- pre-transposed / pre-scaled params (no in-kernel .T) ---------------
    w_t = w.T.astype(jnp.bfloat16)                                # (D, V)
    a_t = lora_a.T.astype(jnp.bfloat16)                           # (D, r)
    b_t = (lora_b.T * scaling).astype(jnp.float32)                # (r, V), scaled
    bias2d = bias.reshape(1, V).astype(jnp.float32)               # (1, V)

    # --- tile sizes & zero-padding so every block is full and lane-dense ----
    tm = min(tm, _round_up(rows, 8))
    tn = min(tn, _round_up(V, 128))
    tk = min(tk, _round_up(D, 128))
    rows_p = _round_up(rows, tm)
    V_p = _round_up(V, tn)
    D_p = _round_up(D, tk)

    x2d = jnp.pad(x2d, ((0, rows_p - rows), (0, D_p - D)))
    w_t = jnp.pad(w_t, ((0, D_p - D), (0, V_p - V)))
    a_t = jnp.pad(a_t, ((0, D_p - D), (0, 0)))
    b_t = jnp.pad(b_t, ((0, 0), (0, V_p - V)))
    bias2d = jnp.pad(bias2d, ((0, 0), (0, V_p - V)))

    grid = (rows_p // tm, V_p // tn, D_p // tk)

    logits_p = pl.pallas_call(
        _lora_head_kernel,
        out_shape=jax.ShapeDtypeStruct((rows_p, V_p), jnp.float32),
        grid_spec=pltpu.PrefetchScalarGridSpec(
            num_scalar_prefetch=0,
            grid=grid,
            in_specs=[
                pl.BlockSpec((tm, tk), lambda i, j, k: (i, k)),   # x
                pl.BlockSpec((tk, tn), lambda i, j, k: (k, j)),   # W^T
                pl.BlockSpec((tk, r), lambda i, j, k: (k, 0)),    # A^T
                pl.BlockSpec((r, tn), lambda i, j, k: (0, j)),    # B^T (scaled)
                pl.BlockSpec((1, tn), lambda i, j, k: (0, j)),    # bias
            ],
            out_specs=pl.BlockSpec((tm, tn), lambda i, j, k: (i, j)),
            scratch_shapes=[
                pltpu.VMEM((tm, tn), jnp.float32),   # base accumulator
                pltpu.VMEM((tm, r), jnp.float32),    # LoRA rank-r accumulator
            ],
        ),
        compiler_params=pltpu.CompilerParams(
            # rows/V axes parallel (v7x megacore sharding), K reduction last.
            dimension_semantics=("parallel", "parallel", "arbitrary")),
    )(x2d, w_t, a_t, b_t, bias2d)

    return logits_p[:rows, :V].reshape(B, L, V)


def init_params(key, *, d_model, vocab_size, maxlen, r=16, lora_alpha=1.0):
    ks = jax.random.split(key, 5)
    return {
        "te": jax.random.normal(ks[0], (vocab_size, d_model), jnp.float32) * 0.02,
        "pem": jax.random.normal(ks[1], (maxlen, d_model), jnp.float32) * 0.02,
        "w": jax.random.normal(ks[2], (vocab_size, d_model), jnp.float32) * 0.02,
        "bias": jnp.zeros((vocab_size,), jnp.float32),
        # loralib default inits A~kaiming, B=0; use nonzero B here so the
        # LoRA path is actually exercised in this synthetic kernel.
        "lora_a": jax.random.normal(ks[3], (r, d_model), jnp.float32) * 0.1,
        "lora_b": jax.random.normal(ks[4], (vocab_size, r), jnp.float32) * 0.1,
        "scaling": lora_alpha / r,
    }


if __name__ == "__main__":
    # small shapes consistent with the module's forward
    B, L = 2, 8
    d_model, vocab_size, maxlen = 32, 64, 16

    key = jax.random.PRNGKey(0)
    pkey, ikey = jax.random.split(key)
    params = init_params(pkey, d_model=d_model, vocab_size=vocab_size,
                         maxlen=maxlen, r=16)

    input_ids = jax.random.randint(ikey, (B, L), 0, vocab_size, dtype=jnp.int32)

    logits = transformer_forward(input_ids, params)
    logits = jax.block_until_ready(logits)
    assert logits.shape == (B, L, vocab_size)

    # reference check in plain JAX, using the same bf16-cast operands the
    # kernel streams (weights/activations bf16, f32 accumulation).
    xb = (jnp.take(params["te"], input_ids, axis=0) + params["pem"][:L][None])
    xb = xb.reshape(B * L, d_model).astype(jnp.bfloat16).astype(jnp.float32)
    wtb = params["w"].T.astype(jnp.bfloat16).astype(jnp.float32)
    atb = params["lora_a"].T.astype(jnp.bfloat16).astype(jnp.float32)
    btb = (params["lora_b"].T * params["scaling"]).astype(jnp.float32)
    ref = (xb @ wtb + params["bias"][None, :] + (xb @ atb) @ btb)
    ref = ref.reshape(B, L, vocab_size)

    assert jnp.allclose(logits, ref, atol=1e-3, rtol=1e-2), (
        float(jnp.max(jnp.abs(logits - ref))))

    print("KERNEL_OK")
</pallas_src>

<mosaic_0001>
module attributes {stable_mosaic.version = 11 : i64} {
  func.func @_lora_head_kernel(%arg0: i32, %arg1: i32, %arg2: i32, %arg3: memref<16x128xbf16, #tpu.memory_space<vmem>>, %arg4: memref<128x128xbf16, #tpu.memory_space<vmem>>, %arg5: memref<128x16xbf16, #tpu.memory_space<vmem>>, %arg6: memref<16x128xf32, #tpu.memory_space<vmem>>, %arg7: memref<1x128xf32, #tpu.memory_space<vmem>>, %arg8: memref<16x128xf32, #tpu.memory_space<vmem>>, %arg9: memref<16x128xf32, #tpu.memory_space<vmem>>, %arg10: memref<16x16xf32, #tpu.memory_space<vmem>>) attributes {dimension_semantics = [#tpu.dimension_semantics<parallel>, #tpu.dimension_semantics<parallel>, #tpu.dimension_semantics<arbitrary>], iteration_bounds = array<i64: 1, 1, 1>, scalar_prefetch = 0 : i64, scratch_operands = 2 : i64, tpu.core_type = #tpu.core_type<tc>, window_params = [{transform_indices = @transform_0, window_bounds = array<i64: 16, 128>}, {transform_indices = @transform_1, window_bounds = array<i64: 128, 128>}, {transform_indices = @transform_2, window_bounds = array<i64: 128, 16>}, {transform_indices = @transform_3, window_bounds = array<i64: 16, 128>}, {transform_indices = @transform_4, window_bounds = array<i64: 1, 128>}, {transform_indices = @transform_5, window_bounds = array<i64: 16, 128>}]} {
    %c0_i32 = arith.constant 0 : i32
    %0 = arith.cmpi eq, %arg2, %c0_i32 : i32
    %1 = arith.extui %0 : i1 to i32
    %c0_i32_0 = arith.constant 0 : i32
    %2 = arith.cmpi ne, %1, %c0_i32_0 : i32
    scf.if %2 {
      %c0_17 = arith.constant 0 : index
      %c0_18 = arith.constant 0 : index
      %17 = vector.load %arg7[%c0_17, %c0_18] : memref<1x128xf32, #tpu.memory_space<vmem>>, vector<1x128xf32>
      %18 = vector.shape_cast %17 : vector<1x128xf32> to vector<1x128xf32>
      %19 = vector.broadcast %18 : vector<1x128xf32> to vector<16x128xf32>
      %c0_19 = arith.constant 0 : index
      %c0_20 = arith.constant 0 : index
      %20 = vector.load %arg9[%c0_19, %c0_20] : memref<16x128xf32, #tpu.memory_space<vmem>>, vector<16x128xf32>
      tpu.vector_store %arg9[%c0_19, %c0_20], %19 {strides = array<i32>} : memref<16x128xf32, #tpu.memory_space<vmem>>, vector<16x128xf32>,
      %cst_21 = arith.constant 0.000000e+00 : f32
      %21 = vector.broadcast %cst_21 : f32 to vector<16x16xf32>
      %c0_22 = arith.constant 0 : index
      %c0_23 = arith.constant 0 : index
      %22 = vector.load %arg10[%c0_22, %c0_23] : memref<16x16xf32, #tpu.memory_space<vmem>>, vector<16x16xf32>
      tpu.vector_store %arg10[%c0_22, %c0_23], %21 {strides = array<i32>} : memref<16x16xf32, #tpu.memory_space<vmem>>, vector<16x16xf32>,
    } else {
    }
    %c0 = arith.constant 0 : index
    %c0_1 = arith.constant 0 : index
    %3 = vector.load %arg3[%c0, %c0_1] : memref<16x128xbf16, #tpu.memory_space<vmem>>, vector<16x128xbf16>
    %c0_2 = arith.constant 0 : index
    %c0_3 = arith.constant 0 : index
    %4 = vector.load %arg9[%c0_2, %c0_3] : memref<16x128xf32, #tpu.memory_space<vmem>>, vector<16x128xf32>
    %c0_4 = arith.constant 0 : index
    %c0_5 = arith.constant 0 : index
    %5 = vector.load %arg4[%c0_4, %c0_5] : memref<128x128xbf16, #tpu.memory_space<vmem>>, vector<128x128xbf16>
    %cst = arith.constant dense<0.000000e+00> : vector<16x128xf32>
    %6 = tpu.matmul %3, %5, %cst {dimension_numbers = #tpu.dot_dimension_numbers<[1], [0], [0], [1], [0, 0, 1, 1], [], []>} : vector<16x128xbf16>, vector<128x128xbf16>, vector<16x128xf32> -> vector<16x128xf32>
    %7 = arith.addf %4, %6 : vector<16x128xf32>
    %c0_6 = arith.constant 0 : index
    %c0_7 = arith.constant 0 : index
    %8 = vector.load %arg9[%c0_6, %c0_7] : memref<16x128xf32, #tpu.memory_space<vmem>>, vector<16x128xf32>
    tpu.vector_store %arg9[%c0_6, %c0_7], %7 {strides = array<i32>} : memref<16x128xf32, #tpu.memory_space<vmem>>, vector<16x128xf32>,
    %c0_8 = arith.constant 0 : index
    %c0_9 = arith.constant 0 : index
    %9 = vector.load %arg10[%c0_8, %c0_9] : memref<16x16xf32, #tpu.memory_space<vmem>>, vector<16x16xf32>
    %c0_10 = arith.constant 0 : index
    %c0_11 = arith.constant 0 : index
    %10 = vector.load %arg5[%c0_10, %c0_11] : memref<128x16xbf16, #tpu.memory_space<vmem>>, vector<128x16xbf16>
    %cst_12 = arith.constant dense<0.000000e+00> : vector<16x16xf32>
    %11 = tpu.matmul %3, %10, %cst_12 {dimension_numbers = #tpu.dot_dimension_numbers<[1], [0], [0], [1], [0, 0, 1, 1], [], []>} : vector<16x128xbf16>, vector<128x16xbf16>, vector<16x16xf32> -> vector<16x16xf32>
    %12 = arith.addf %9, %11 : vector<16x16xf32>
    %c0_13 = arith.constant 0 : index
    %c0_14 = arith.constant 0 : index
    %13 = vector.load %arg10[%c0_13, %c0_14] : memref<16x16xf32, #tpu.memory_space<vmem>>, vector<16x16xf32>
    tpu.vector_store %arg10[%c0_13, %c0_14], %12 {strides = array<i32>} : memref<16x16xf32, #tpu.memory_space<vmem>>, vector<16x16xf32>,
    %c0_i32_15 = arith.constant 0 : i32
    %14 = arith.cmpi eq, %arg2, %c0_i32_15 : i32
    %15 = arith.extui %14 : i1 to i32
    %c0_i32_16 = arith.constant 0 : i32
    %16 = arith.cmpi ne, %15, %c0_i32_16 : i32
    scf.if %16 {
      %c0_17 = arith.constant 0 : index
      %c0_18 = arith.constant 0 : index
      %17 = vector.load %arg10[%c0_17, %c0_18] : memref<16x16xf32, #tpu.memory_space<vmem>>, vector<16x16xf32>
      %c0_19 = arith.constant 0 : index
      %c0_20 = arith.constant 0 : index
      %18 = vector.load %arg6[%c0_19, %c0_20] : memref<16x128xf32, #tpu.memory_space<vmem>>, vector<16x128xf32>
      %cst_21 = arith.constant dense<0.000000e+00> : vector<16x128xf32>
      %19 = tpu.matmul %17, %18, %cst_21 {dimension_numbers = #tpu.dot_dimension_numbers<[1], [0], [0], [1], [0, 0, 1, 1], [], []>} : vector<16x16xf32>, vector<16x128xf32>, vector<16x128xf32> -> vector<16x128xf32>
      %c0_22 = arith.constant 0 : index
      %c0_23 = arith.constant 0 : index
      %20 = vector.load %arg9[%c0_22, %c0_23] : memref<16x128xf32, #tpu.memory_space<vmem>>, vector<16x128xf32>
      %21 = arith.addf %20, %19 : vector<16x128xf32>
      %c0_24 = arith.constant 0 : index
      %c0_25 = arith.constant 0 : index
      %22 = vector.load %arg8[%c0_24, %c0_25] : memref<16x128xf32, #tpu.memory_space<vmem>>, vector<16x128xf32>
      tpu.vector_store %arg8[%c0_24, %c0_25], %21 {strides = array<i32>} : memref<16x128xf32, #tpu.memory_space<vmem>>, vector<16x128xf32>,
    } else {
    }
    return
  }
  func.func @transform_0(%arg0: i32, %arg1: i32, %arg2: i32) -> (i32, i32) {
    %c0_i32 = arith.constant 0 : i32
    return %arg0, %arg2 : i32, i32
  }
  func.func @transform_1(%arg0: i32, %arg1: i32, %arg2: i32) -> (i32, i32) {
    %c0_i32 = arith.constant 0 : i32
    return %arg2, %arg1 : i32, i32
  }
  func.func @transform_2(%arg0: i32, %arg1: i32, %arg2: i32) -> (i32, i32) {
    %c0_i32 = arith.constant 0 : i32
    %c0_i32_0 = arith.constant 0 : i32
    return %arg2, %c0_i32 : i32, i32
  }
  func.func @transform_3(%arg0: i32, %arg1: i32, %arg2: i32) -> (i32, i32) {
    %c0_i32 = arith.constant 0 : i32
    %c0_i32_0 = arith.constant 0 : i32
    return %c0_i32, %arg1 : i32, i32
  }
  func.func @transform_4(%arg0: i32, %arg1: i32, %arg2: i32) -> (i32, i32) {
    %c0_i32 = arith.constant 0 : i32
    %c0_i32_0 = arith.constant 0 : i32
    return %c0_i32, %arg1 : i32, i32
  }
  func.func @transform_5(%arg0: i32, %arg1: i32, %arg2: i32) -> (i32, i32) {
    %c0_i32 = arith.constant 0 : i32
    return %arg0, %arg1 : i32, i32
  }
}

</mosaic_0001>

<bundles_post_ra>
// kernel: tpu_custom_call.1
= control target key start
LH: loop header
LB: loop body
LE: loop exit
PB: predicated region body
PF: predicated region fallthrough
CT: control target
= control target key end

     0   :  { %10 = vsyncpa [#allocation5], 0  ;;  %s658_s0 = inlined_call_operand.vmem [shape: bf16[16,128], index: 0, kind: input, shape index: {}]   ;;  %s659_s1 = inlined_call_operand.vmem [shape: bf16[128,128], index: 1, kind: input, shape index: {}]   ;;  %s660_s2 = inlined_call_operand.vmem [shape: bf16[128,16], index: 2, kind: input, shape index: {}]   ;;  %s661_s3 = inlined_call_operand.hbm [shape: f32[16,128], index: 3, kind: input, shape index: {}]   ;;  %s662_s4 = inlined_call_operand.vmem [shape: f32[1,128], index: 4, kind: input, shape index: {}]   ;;  %s663_s5 = inlined_call_operand.hbm [shape: f32[16,128], index: 5, kind: output, shape index: {}]  }
   0x1   :  { %11 = vsyncpa [#allocation6], 0  ;;  %s550_s18 = smov [#allocation4]  }
   0x2   :  { %s23_s19 = sshll.u32 %s550_s18, 4  ;;  %s24_s19 = int_to_ptr.vmem [resolvable:$true] %s23_s19 }
   0x3   :  { %s514_s20 = scalar_lea.vmem %s24_s19, 256  ;;  %p519_p1 = scmp.lt.s32.totalorder %s24_s19, %s24_s19 }
   0x4   :  { %p515_p0 = scmp.ne.s32.totalorder %s24_s19, %s514_s20  ;;  %p520_p2 = scmp.lt.s32.totalorder %s514_s20, %s514_s20 }
   0x6   :  { %p521_p3 = por %p520_p2, %p519_p1 }
   0x8   :  { %p522_p4 = pnand %p521_p3, %p515_p0 }
   0xa   :  { %525 = shalt.err (!%p522_p4)
}
   0xb   :  { %s551_s21 = smov 128   ;;  %s552_s22 = smov 8  }
   0xc   :  { %29 = dma.hbm_to_vmem [thread:$0]  %s661_s3, 256, %s24_s19, [#allocation5], %s551_s21, %s551_s21, %s552_s22  }
   0xd   :  { %546 = dma.done.wait [#allocation5], 256  }
   0xe   :  { %547 = vsyncadd [#allocation5], 4294967040  ;;  %vm49_vm0 = vcmask 130048   ;;  %v553_v0 = vmov 0.0   ;;  %vm554_vm1 = vmmov 0   ;;  %v489_v1 = vld [vmem:[%s660_s2 + $0x38] sm:$0xff]  }
   0xf   :  { %456 = vmatprep.subr.bf16.mxu1 %v553_v0  ;;  %472 = vmatprep.mubr.msk.bf16.mxu1 %vm554_vm1, %v553_v0  ;;  %50 = vst.msk [vmem:[#allocation3] sm:$0xff] %vm49_vm0, %v553_v0  ;;  %51 = vst.msk [vmem:[#allocation3 + $0x8] sm:$0xff] %vm49_vm0, %v553_v0  ;;  %v490_v2 = vld [vmem:[%s660_s2 + $0x30] sm:$0xff]   ;;  %v491_v3 = vld [vmem:[%s660_s2 + $0x28] sm:$0xff]   ;;  %s555_s8 = smov [#allocation7]  }
  0x10   :  { %436 = vmatprep.subr.bf16.mxu0 %v553_v0  ;;  %452 = vmatprep.mubr.msk.bf16.mxu0 %vm554_vm1, %v553_v0  ;;  %v498_v4 = vld [vmem:[%s659_s1 + $0x38] sm:$0xff]   ;;  %v492_v5 = vld [vmem:[%s660_s2 + $0x20] sm:$0xff]   ;;  %v499_v6 = vld [vmem:[%s659_s1 + $0x30] sm:$0xff]   ;;  %s382_s9 = sshll.u32 %s555_s8, 4  ;;  %s383_s9 = int_to_ptr.vmem [resolvable:$true] %s382_s9 }
  0x11   :  { %457 = vmatpush3.bf16.msra.mxu1 %v489_v1  ;;  %437 = vmatpush3.bf16.msra.mxu0 %v498_v4  ;;  %v493_v7 = vld [vmem:[%s660_s2 + $0x18] sm:$0xff]   ;;  %v500_v8 = vld [vmem:[%s659_s1 + $0x28] sm:$0xff]   ;;  %v494_v9 = vld [vmem:[%s660_s2 + $0x10] sm:$0xff]   ;;  %s526_s10 = scalar_lea.vmem %s383_s9, 256  ;;  %p531_p6 = scmp.lt.s32.totalorder %s383_s9, %s383_s9 }
  0x12   :  { %458 = vmatprep.subr.bf16.mxu1 %v553_v0  ;;  %438 = vmatprep.subr.bf16.mxu0 %v553_v0  ;;  %v501_v10 = vld [vmem:[%s659_s1 + $0x20] sm:$0xff]   ;;  %v495_v11 = vld [vmem:[%s660_s2 + $0x8] sm:$0xff]   ;;  %v502_v12 = vld [vmem:[%s659_s1 + $0x18] sm:$0xff]   ;;  %p527_p5 = scmp.ne.s32.totalorder %s383_s9, %s526_s10  ;;  %p532_p7 = scmp.lt.s32.totalorder %s526_s10, %s526_s10 }
  0x13   :  { %v496_v13 = vld [vmem:[%s660_s2] sm:$0xff]   ;;  %v503_v14 = vld [vmem:[%s659_s1 + $0x10] sm:$0xff]   ;;  %v504_v16 = vld [vmem:[%s659_s1 + $0x8] sm:$0xff]  }
  0x14   :  { %v497_v15 = vld [vmem:[%s658_s0] sm:$0xff]   ;;  %v289_v18 = vld [vmem:[#allocation4 + $0x8] sm:$0xff]  ;;  %v288_v19 = vld [vmem:[#allocation4] sm:$0xff]  ;;  %p533_p8 = por %p532_p7, %p531_p6 }
  0x15   :  { %459 = vmatpush3.bf16.msra.mxu1 %v490_v2  ;;  %439 = vmatpush3.bf16.msra.mxu0 %v499_v6  ;;  %v505_v17 = vld [vmem:[%s659_s1] sm:$0xff]  }
  0x16   :  { %460 = vmatprep.subr.bf16.mxu1 %v553_v0  ;;  %440 = vmatprep.subr.bf16.mxu0 %v553_v0  ;;  %v171_v20 = vld [vmem:[#allocation3] sm:$0xff]  ;;  %v172_v24 = vld [vmem:[#allocation3 + $0x8] sm:$0xff]  ;;  %p534_p9 = pnand %p533_p8, %p527_p5 }
  0x17   :  { %v394_v34 = vld [vmem:[%s662_s4] ss:$0 sm:$0xff] }
  0x19   :  { %461 = vmatpush3.bf16.msra.mxu1 %v491_v3  ;;  %441 = vmatpush3.bf16.msra.mxu0 %v500_v8 }
  0x1a   :  { %462 = vmatprep.subr.bf16.mxu1 %v553_v0  ;;  %442 = vmatprep.subr.bf16.mxu0 %v553_v0 }
  0x1d   :  { %463 = vmatpush3.bf16.msra.mxu1 %v492_v5  ;;  %443 = vmatpush3.bf16.msra.mxu0 %v501_v10 }
  0x1e   :  { %464 = vmatprep.subr.bf16.mxu1 %v553_v0  ;;  %444 = vmatprep.subr.bf16.mxu0 %v553_v0 }
  0x21   :  { %465 = vmatpush3.bf16.msra.mxu1 %v493_v7  ;;  %445 = vmatpush3.bf16.msra.mxu0 %v502_v12 }
  0x22   :  { %466 = vmatprep.subr.bf16.mxu1 %v553_v0  ;;  %446 = vmatprep.subr.bf16.mxu0 %v553_v0 }
  0x25   :  { %467 = vmatpush3.bf16.msra.mxu1 %v494_v9  ;;  %447 = vmatpush3.bf16.msra.mxu0 %v503_v14 }
  0x26   :  { %468 = vmatprep.subr.bf16.mxu1 %v553_v0  ;;  %448 = vmatprep.subr.bf16.mxu0 %v553_v0 }
  0x29   :  { %469 = vmatpush3.bf16.msra.mxu1 %v495_v11  ;;  %449 = vmatpush3.bf16.msra.mxu0 %v504_v16 }
  0x2a   :  { %470 = vmatprep.subr.bf16.mxu1 %v553_v0  ;;  %450 = vmatprep.subr.bf16.mxu0 %v553_v0 }
  0x2d   :  { %471 = vmatpush3.bf16.msra.mxu1 %v496_v13  ;;  %451 = vmatpush3.bf16.msra.mxu0 %v505_v17 }
  0x2e   :  { %476 = vmatprep.subr.mxu0 %v289_v18 }
  0x30   :  { %473 = vmatmul.mubr.bf16.vlgmr.msra.gmra.mxu1 %v497_v15  ;;  %453 = vmatmul.mubr.bf16.vlgmr.msra.gmra.mxu0 %v497_v15 }
  0x31   :  { %477 = vmatpush3.msra.mxu0 %v289_v18 }
  0x32   :  { %478 = vmatprep.subr.mxu0 %v288_v19 }
  0x33   :  { %479 = vmatpush3.msra.mxu0 %v288_v19 }
  0xf0   :  { %v271_v21 = vpop.f32.mrf.mxu1  ;;  %v160_v28 = vpop.f32.mrf.mxu0 }
  0xf1   :  { %v278_v22 = vadd.f32 %v271_v21, %v171_v20  ;;  %v167_v37 = vadd.f32 %v394_v34, %v160_v28 }
  0xf2   :  { %v474_v23 = vpop.f32.mrf.mxu1  ;;  %v454_v30 = vpop.f32.mrf.mxu0 }
  0xf3   :  { %281 = vst.msk [vmem:[#allocation3] sm:$0xff] %vm49_vm0, %v278_v22 }
  0xf4   :  { %v274_v25 = vpop.f32.mrf.mxu1  ;;  %v163_v31 = vpop.f32.mrf.mxu0 }
  0xf5   :  { %v279_v26 = vadd.f32 %v274_v25, %v172_v24  ;;  %v168_v35 = vadd.f32 %v394_v34, %v163_v31 }
  0xf6   :  { %v475_v27 = vpop.f32.mrf.mxu1  ;;  %v455_v33 = vpop.f32.mrf.mxu0 }
  0xf7   :  { %282 = vst.msk [vmem:[#allocation3 + $0x8] sm:$0xff] %vm49_vm0, %v279_v26 }
  0xfa   :  { %v286_v29 = vld [vmem:[#allocation3] sm:$0xff] }
  0xfb   :  { %480 = vmatprep.mubr.msk.f32.mxu0 %vm49_vm0, %v286_v29 }
  0xfe   :  { %v287_v32 = vld [vmem:[#allocation3 + $0x8] sm:$0xff] }
  0xff   :  { %481 = vmatmul.mubr.msk.f32.vlgmr.msra.gmra.mxu0 %vm49_vm0, %v287_v32 }
 0x1bf   :  { %v482_v36 = vpop.f32.mrf.mxu0 }
 0x1c0   :  { %v374_v38 = vadd.f32 %v482_v36, %v168_v35 }
 0x1c1   :  { %v362_v39 = vpop.f32.mrf.mxu0 }
 0x1c2   :  { %376 = vst [vmem:[#allocation7 + $0x8] sm:$0xff] %v374_v38  ;;  %v373_v40 = vadd.f32 %v362_v39, %v167_v37 }
 0x1c4   :  { %375 = vst [vmem:[#allocation7] sm:$0xff] %v373_v40 }
 0x1c5   :  { %537 = shalt.err (!%p534_p9)
}
 0x1c6   :  { %388 = dma.vmem_to_hbm [thread:$0]  %s383_s9, 256, %s663_s5, [#allocation6], %s551_s21, %s551_s21, %s552_s22  }
 0x1c7   :  { %548 = dma.done.wait [#allocation6], 256  }
 0x1c8   :  { %549 = vsyncadd [#allocation6], 4294967040 }
 0x1c9   :  { %392 = vsyncpa [#allocation5], 1 }
 0x1ca   :  { %393 = vsyncpa [#allocation6], 1 }

</bundles_post_ra>
